<compile_context>
chip_gen: v7x
topology: tpu7x:2x2x1
jax: 0.10.0
libtpu: 0.0.40
codegen_flags: <defaults>
</compile_context>

<pallas_src>
import numpy as np
import jax
import jax.numpy as jnp
from jax import lax
from jax.experimental import pallas as pl
from jax.experimental.pallas import tpu as pltpu


def _act(x):
    return jax.nn.gelu(x, approximate=True)


def _round_up(x, m):
    return ((x + m - 1) // m) * m


def _vmem_limit_bytes(n_p, n_k, db):
    """Per-block VMEM estimate (double-buffered I/O + scratch + intermediates), 2x headroom."""
    f32, bf16 = 4, 2
    dbl = 2
    inputs = dbl * (3 * 2 * n_k * f32          # duplicated k-vectors^T
                    + n_p * 3 * f32            # positions
                    + n_p * db * bf16          # h channel block
                    + n_k * db * bf16)         # filter channel block
    outputs = dbl * (n_p * 2 * db * bf16)      # fused real|imag block
    scratch = n_p * 2 * n_k * f32              # cached cos|sin
    interm = (2 * n_k * db * f32               # ssum
              + 2 * n_k * db * f32             # sr_f + si_f
              + 2 * n_k * 2 * db * bf16        # rhs block
              + n_p * 2 * db * f32             # pred before cast
              + n_p * 2 * n_k * bf16)          # bf16 cos|sin operand
    total = inputs + outputs + scratch + interm
    # floor at the 16 MiB default, cap well below the v7x 64 MiB/TC physical budget
    return int(min(max(2 * total, 16 * 1024 * 1024), 48 * 1024 * 1024))


def long_range_kernel(kT2_ref, pos_ref, h_ref, filt_ref, out_ref, cs_ref):
    """Grid = (structure b, channel block c). Blocks hold only structure b's (padded) atoms."""
    n_p, two_nk = cs_ref.shape
    n_k = two_nk // 2

    # cos/sin of the phases depend only on b -> compute once per structure (c == 0) and cache.
    @pl.when(pl.program_id(1) == 0)
    def _():
        kT2 = kT2_ref[0]          # [3, 2*N_k]   (k-vectors duplicated along lanes)
        pos = pos_ref[0]          # [Np, 3]      (padded rows have h == 0)
        # phase[i, j] = r_i · k_j — depth-3 contraction as 3 VPU broadcast FMAs
        # (an MXU matmul with K=3 would run at ~3/256 utilisation).
        phase = (pos[:, 0:1] * kT2[0:1, :]
                 + pos[:, 1:2] * kT2[1:2, :]
                 + pos[:, 2:3] * kT2[2:3, :])                              # [Np, 2*N_k]
        # cos(x) in lanes [:N_k], sin(x) = cos(x - pi/2) in lanes [N_k:]:
        # one EUP pass over half the vregs compared to separate cos + sin calls.
        shift = jnp.where(
            lax.broadcasted_iota(jnp.int32, (1, two_nk), 1) >= n_k,
            jnp.float32(0.5 * np.pi), jnp.float32(0.0))
        cs_ref[...] = jnp.cos(phase - shift)                               # [cos | sin]

    csb = cs_ref[...].astype(jnp.bfloat16)     # bf16 only at the MXU boundary (VPU/EUP stay f32)
    hh = h_ref[0]                              # [Np, db]   bf16 storage
    filt = filt_ref[0].astype(jnp.float32)     # [N_k, db]  bf16 storage, f32 elementwise

    # structure factor: ONE merged MXU matmul gives [cos^T h ; sin^T h] = [s_real ; -s_imag]
    ssum = lax.dot_general(csb, hh, (((0,), (0,)), ((), ())),
                           preferred_element_type=jnp.float32)             # [2*N_k, db]
    sr_f = ssum[:n_k] * filt                   # s_real * filter
    si_f = -ssum[n_k:] * filt                  # s_imag * filter

    # gather: ONE complex matmul via the 2x2 block trick:
    #   [cos sin] @ [[ sr_f  si_f],
    #                [-si_f  sr_f]]  =  [pred_real | pred_imag]
    rhs = jnp.concatenate(
        [jnp.concatenate([sr_f, si_f], axis=1),
         jnp.concatenate([-si_f, sr_f], axis=1)], axis=0).astype(jnp.bfloat16)  # [2*N_k, 2*db]
    pred = jnp.dot(csb, rhs, preferred_element_type=jnp.float32)           # [Np, 2*db]

    out_ref[...] = pred.astype(out_ref.dtype)[None, :, :]                  # fused lane-dense write


def long_range_interaction(k_vectors, positions, batch, h, params):
    """Hoisted filter MLP + per-structure sort/pad (host side: `batch` must be concrete),
    bf16 storage for the bandwidth-heavy arrays, then the fused Pallas kernel."""
    B, N_k, _ = k_vectors.shape
    N_atoms, d = h.shape
    w1, b1, w2, b2, w3, b3 = params

    # ---- hoisted filter MLP (depends only on k_vectors; tiny, runs once in XLA) ----
    z = _act(k_vectors @ w1 + b1)
    z = _act(z @ w2 + b2)
    filt = z @ w3 + b3                                        # [B, N_k, d] f32

    # ---- lane-dense channel padding + channel blocking (2nd, VMEM-capping grid axis) ----
    d_pad = _round_up(d, 128)
    db = 128                                                  # 2*db = 256-lane matmul output
    C = d_pad // db

    # ---- host-side per-structure sort + pad so grid step b sees only its own atoms ----
    batch_np = np.asarray(batch)                              # requires concrete batch indices
    counts = np.bincount(batch_np, minlength=B)
    Np = max(16, _round_up(int(counts.max()), 16))            # multiple of 16: bf16 sublane packing

    order = np.argsort(batch_np, kind="stable")
    sorted_batch = batch_np[order]
    starts = np.concatenate(([0], np.cumsum(counts)))[:-1]
    rank = np.arange(N_atoms) - starts[sorted_batch]
    padded_row = (sorted_batch * Np + rank).astype(np.int32)  # destination row in [B*Np]
    atom_to_padded = np.empty(N_atoms, dtype=np.int32)
    atom_to_padded[order] = padded_row

    # TODO(synk): when downstream consumers accept the sorted/padded layout, skip this scatter
    # and the final un-sort gather to remove two extra HBM passes in the mem-bound regime.
    pos_pad = jnp.zeros((B * Np, 3), jnp.float32).at[padded_row].set(positions[order])
    h_cols = jnp.pad(h.astype(jnp.bfloat16), ((0, 0), (0, d_pad - d)))
    h_pad = jnp.zeros((B * Np, d_pad), jnp.bfloat16).at[padded_row].set(h_cols[order])
    pos_pad = pos_pad.reshape(B, Np, 3)
    h_pad = h_pad.reshape(B, Np, d_pad)

    kT = jnp.transpose(k_vectors, (0, 2, 1))                  # [B, 3, N_k]
    kT2 = jnp.concatenate([kT, kT], axis=-1)                  # lanes [:N_k]->cos, [N_k:]->sin
    filt_pad = jnp.pad(filt, ((0, 0), (0, 0), (0, d_pad - d))).astype(jnp.bfloat16)

    out = pl.pallas_call(
        long_range_kernel,
        out_shape=jax.ShapeDtypeStruct((B, Np, C * 2 * db), jnp.bfloat16),
        grid_spec=pltpu.PrefetchScalarGridSpec(
            num_scalar_prefetch=0,
            grid=(B, C),                                      # structures x channel blocks
            in_specs=[
                pl.BlockSpec((1, 3, 2 * N_k), lambda b, c: (b, 0, 0)),   # duplicated k-vectors^T
                pl.BlockSpec((1, Np, 3), lambda b, c: (b, 0, 0)),        # positions (own atoms)
                pl.BlockSpec((1, Np, db), lambda b, c: (b, 0, c)),       # h          (channel blk)
                pl.BlockSpec((1, N_k, db), lambda b, c: (b, 0, c)),      # filter MLP (channel blk)
            ],
            out_specs=pl.BlockSpec((1, Np, 2 * db), lambda b, c: (b, 0, c)),
            scratch_shapes=[pltpu.VMEM((Np, 2 * N_k), jnp.float32)],     # cached cos|sin
        ),
        compiler_params=pltpu.CompilerParams(
            # channel axis stays "arbitrary" so the cos/sin cache written at c == 0 is always
            # valid no matter how megacore shards the parallel structure axis.
            dimension_semantics=("parallel", "arbitrary"),
            vmem_limit_bytes=_vmem_limit_bytes(Np, N_k, db),
        ),
    )(kT2, pos_pad, h_pad, filt_pad)

    # ---- split fused real|imag channel blocks, un-pad / un-sort, true channel width ----
    out = out.reshape(B * Np, C, 2, db)
    gather = jnp.asarray(atom_to_padded)
    pred_r = out[:, :, 0, :].reshape(B * Np, d_pad)[gather, :d].astype(jnp.float32)
    pred_i = out[:, :, 1, :].reshape(B * Np, d_pad)[gather, :d].astype(jnp.float32)
    return pred_r + 1j * pred_i


def reference(k_vectors, positions, batch, h, params, emulate_bf16=False):
    """Plain-JAX reference of the intended module semantics.

    emulate_bf16=True quantizes the same values the kernel stores / feeds to the MXU in bf16,
    so the kernel can be checked with a tight tolerance; False gives the pure-f32 reference."""
    w1, b1, w2, b2, w3, b3 = params
    B, N_k, _ = k_vectors.shape
    N_atoms, d = h.shape

    def q(x):
        return x.astype(jnp.bfloat16).astype(jnp.float32) if emulate_bf16 else x

    kb_atom = k_vectors[batch]                                   # [N_atoms, N_k, 3]
    phase = jnp.einsum('nd,nkd->nk', positions, kb_atom)         # [N_atoms, N_k]
    cosp, sinp = q(jnp.cos(phase)), q(jnp.sin(phase))
    hq = q(h)

    s_real = jnp.zeros((B, N_k, d), jnp.float32).at[batch].add(cosp[:, :, None] * hq[:, None, :])
    s_imag = jnp.zeros((B, N_k, d), jnp.float32).at[batch].add(-sinp[:, :, None] * hq[:, None, :])

    z = _act(k_vectors @ w1 + b1)
    z = _act(z @ w2 + b2)
    filt = q(z @ w3 + b3)                                        # [B, N_k, d]

    sr_f, si_f = q(s_real * filt), q(s_imag * filt)
    sr_a, si_a = sr_f[batch], si_f[batch]                        # [N_atoms, N_k, d]
    pred_r = jnp.sum(cosp[:, :, None] * sr_a - sinp[:, :, None] * si_a, axis=1)
    pred_i = jnp.sum(cosp[:, :, None] * si_a + sinp[:, :, None] * sr_a, axis=1)
    return q(pred_r) + 1j * q(pred_i)


def make_params(key, d_pet):
    def lin(kw, kb, fan_in, fan_out):
        bound = 1.0 / np.sqrt(fan_in)
        W = jax.random.uniform(kw, (fan_in, fan_out), jnp.float32, -bound, bound)
        bb = jax.random.uniform(kb, (1, fan_out), jnp.float32, -bound, bound)
        return W, bb

    ks = jax.random.split(key, 6)
    w1, b1 = lin(ks[0], ks[1], 3, d_pet)
    w2, b2 = lin(ks[2], ks[3], d_pet, d_pet)
    w3, b3 = lin(ks[4], ks[5], d_pet, d_pet)
    return (w1, b1, w2, b2, w3, b3)


def _check(k_vectors, positions, batch, h, params, label):
    out = jax.block_until_ready(long_range_interaction(k_vectors, positions, batch, h, params))
    N_atoms, d = h.shape
    assert out.shape == (N_atoms, d), (label, out.shape)

    # tight check against the precision-matched reference (same bf16 storage / MXU operands)
    ref_q = jax.block_until_ready(
        reference(k_vectors, positions, batch, h, params, emulate_bf16=True))
    np.testing.assert_allclose(np.asarray(out.real), np.asarray(ref_q.real), rtol=2e-2, atol=2e-2)
    np.testing.assert_allclose(np.asarray(out.imag), np.asarray(ref_q.imag), rtol=2e-2, atol=2e-2)

    # loose end-to-end check against the pure-f32 reference (bf16 quantization is ~1% RMS)
    ref = jax.block_until_ready(reference(k_vectors, positions, batch, h, params))
    rel = (np.linalg.norm(np.asarray(out - ref)) / np.linalg.norm(np.asarray(ref)))
    assert rel < 5e-2, (label, rel)


if __name__ == "__main__":
    # case 1: d_pad == 128 (single channel block), equal structure sizes
    B, N_k, N_atoms, d_pet = 2, 16, 16, 32
    k_key, p_key, h_key, w_key = jax.random.split(jax.random.PRNGKey(0), 4)
    k_vectors = jax.random.normal(k_key, (B, N_k, 3), dtype=jnp.float32)
    positions = jax.random.uniform(p_key, (N_atoms, 3), jnp.float32, minval=0.0, maxval=5.0)
    batch = jnp.array([0] * (N_atoms // 2) + [1] * (N_atoms // 2), dtype=jnp.int32)
    h = jax.random.normal(h_key, (N_atoms, d_pet), dtype=jnp.float32)
    params = make_params(w_key, d_pet)
    _check(k_vectors, positions, batch, h, params, "case1")

    # case 2: d_pad == 256 (two channel blocks), unequal + interleaved structure assignment
    B, N_k, N_atoms, d_pet = 2, 8, 16, 160
    k_key, p_key, h_key, w_key = jax.random.split(jax.random.PRNGKey(1), 4)
    k_vectors = jax.random.normal(k_key, (B, N_k, 3), dtype=jnp.float32)
    positions = jax.random.uniform(p_key, (N_atoms, 3), jnp.float32, minval=0.0, maxval=5.0)
    batch = jnp.array(np.random.RandomState(0).permutation(
        np.array([0] * 5 + [1] * 11, dtype=np.int32)))
    h = jax.random.normal(h_key, (N_atoms, d_pet), dtype=jnp.float32)
    params = make_params(w_key, d_pet)
    _check(k_vectors, positions, batch, h, params, "case2")

    print("KERNEL_OK")
</pallas_src>

<mosaic_0001>
module attributes {stable_mosaic.version = 11 : i64} {
  func.func @long_range_kernel(%arg0: i32, %arg1: i32, %arg2: memref<1x3x32xf32, #tpu.memory_space<vmem>>, %arg3: memref<1x16x3xf32, #tpu.memory_space<vmem>>, %arg4: memref<1x16x128xbf16, #tpu.memory_space<vmem>>, %arg5: memref<1x16x128xbf16, #tpu.memory_space<vmem>>, %arg6: memref<1x16x256xbf16, #tpu.memory_space<vmem>>, %arg7: memref<16x32xf32, #tpu.memory_space<vmem>>) attributes {dimension_semantics = [#tpu.dimension_semantics<parallel>, #tpu.dimension_semantics<arbitrary>], iteration_bounds = array<i64: 2, 1>, scalar_prefetch = 0 : i64, scratch_operands = 1 : i64, tpu.core_type = #tpu.core_type<tc>, window_params = [{transform_indices = @transform_0, window_bounds = array<i64: 1, 3, 32>}, {transform_indices = @transform_1, window_bounds = array<i64: 1, 16, 3>}, {transform_indices = @transform_2, window_bounds = array<i64: 1, 16, 128>}, {transform_indices = @transform_3, window_bounds = array<i64: 1, 16, 128>}, {transform_indices = @transform_4, window_bounds = array<i64: 1, 16, 256>}]} {
    %c0_i32 = arith.constant 0 : i32
    %0 = arith.cmpi eq, %arg1, %c0_i32 : i32
    %1 = arith.extui %0 : i1 to i32
    %c0_i32_0 = arith.constant 0 : i32
    %2 = arith.cmpi ne, %1, %c0_i32_0 : i32
    scf.if %2 {
      %c0_14 = arith.constant 0 : index
      %c0_15 = arith.constant 0 : index
      %c0_16 = arith.constant 0 : index
      %27 = vector.load %arg2[%c0_14, %c0_15, %c0_16] : memref<1x3x32xf32, #tpu.memory_space<vmem>>, vector<1x3x32xf32>
      %28 = vector.shape_cast %27 : vector<1x3x32xf32> to vector<3x32xf32>
      %c0_17 = arith.constant 0 : index
      %c0_18 = arith.constant 0 : index
      %c0_19 = arith.constant 0 : index
      %29 = vector.load %arg3[%c0_17, %c0_18, %c0_19] : memref<1x16x3xf32, #tpu.memory_space<vmem>>, vector<1x16x3xf32>
      %30 = vector.shape_cast %29 : vector<1x16x3xf32> to vector<16x3xf32>
      %31 = vector.extract_strided_slice %30 {offsets = [0, 0], sizes = [16, 1], strides = [1, 1]} : vector<16x3xf32> to vector<16x1xf32>
      %32 = vector.extract_strided_slice %28 {offsets = [0, 0], sizes = [1, 32], strides = [1, 1]} : vector<3x32xf32> to vector<1x32xf32>
      %33 = vector.broadcast %31 : vector<16x1xf32> to vector<16x32xf32>
      %34 = vector.broadcast %32 : vector<1x32xf32> to vector<16x32xf32>
      %35 = arith.mulf %33, %34 : vector<16x32xf32>
      %36 = vector.extract_strided_slice %30 {offsets = [0, 1], sizes = [16, 1], strides = [1, 1]} : vector<16x3xf32> to vector<16x1xf32>
      %37 = vector.extract_strided_slice %28 {offsets = [1, 0], sizes = [1, 32], strides = [1, 1]} : vector<3x32xf32> to vector<1x32xf32>
      %38 = vector.broadcast %36 : vector<16x1xf32> to vector<16x32xf32>
      %39 = vector.broadcast %37 : vector<1x32xf32> to vector<16x32xf32>
      %40 = arith.mulf %38, %39 : vector<16x32xf32>
      %41 = arith.addf %35, %40 : vector<16x32xf32>
      %42 = vector.extract_strided_slice %30 {offsets = [0, 2], sizes = [16, 1], strides = [1, 1]} : vector<16x3xf32> to vector<16x1xf32>
      %43 = vector.extract_strided_slice %28 {offsets = [2, 0], sizes = [1, 32], strides = [1, 1]} : vector<3x32xf32> to vector<1x32xf32>
      %44 = vector.broadcast %42 : vector<16x1xf32> to vector<16x32xf32>
      %45 = vector.broadcast %43 : vector<1x32xf32> to vector<16x32xf32>
      %46 = arith.mulf %44, %45 : vector<16x32xf32>
      %47 = arith.addf %41, %46 : vector<16x32xf32>
      %48 = tpu.iota {dimensions = array<i32: 1>} : vector<1x32xi32>
      %c16_i32 = arith.constant 16 : i32
      %49 = vector.broadcast %c16_i32 : i32 to vector<1x32xi32>
      %50 = arith.cmpi sge, %48, %49 : vector<1x32xi32>
      %cst_20 = arith.constant 1.57079637 : f32
      %cst_21 = arith.constant 0.000000e+00 : f32
      %51 = vector.broadcast %cst_20 : f32 to vector<1x32xf32>
      %52 = vector.broadcast %cst_21 : f32 to vector<1x32xf32>
      %53 = arith.select %50, %51, %52 : vector<1x32xi1>, vector<1x32xf32>
      %54 = vector.broadcast %53 : vector<1x32xf32> to vector<16x32xf32>
      %55 = arith.subf %47, %54 : vector<16x32xf32>
      %56 = math.cos %55 : vector<16x32xf32>
      %c0_22 = arith.constant 0 : index
      %c0_23 = arith.constant 0 : index
      %57 = vector.load %arg7[%c0_22, %c0_23] : memref<16x32xf32, #tpu.memory_space<vmem>>, vector<16x32xf32>
      tpu.vector_store %arg7[%c0_22, %c0_23], %56 {strides = array<i32>} : memref<16x32xf32, #tpu.memory_space<vmem>>, vector<16x32xf32>,
    } else {
    }
    %c0 = arith.constant 0 : index
    %c0_1 = arith.constant 0 : index
    %3 = vector.load %arg7[%c0, %c0_1] : memref<16x32xf32, #tpu.memory_space<vmem>>, vector<16x32xf32>
    %4 = arith.truncf %3 : vector<16x32xf32> to vector<16x32xbf16>
    %c0_2 = arith.constant 0 : index
    %c0_3 = arith.constant 0 : index
    %c0_4 = arith.constant 0 : index
    %5 = vector.load %arg4[%c0_2, %c0_3, %c0_4] : memref<1x16x128xbf16, #tpu.memory_space<vmem>>, vector<1x16x128xbf16>
    %6 = vector.shape_cast %5 : vector<1x16x128xbf16> to vector<16x128xbf16>
    %c0_5 = arith.constant 0 : index
    %c0_6 = arith.constant 0 : index
    %c0_7 = arith.constant 0 : index
    %7 = vector.load %arg5[%c0_5, %c0_6, %c0_7] : memref<1x16x128xbf16, #tpu.memory_space<vmem>>, vector<1x16x128xbf16>
    %8 = vector.shape_cast %7 : vector<1x16x128xbf16> to vector<16x128xbf16>
    %9 = arith.extf %8 : vector<16x128xbf16> to vector<16x128xf32>
    %cst = arith.constant dense<0.000000e+00> : vector<32x128xf32>
    %10 = tpu.matmul %4, %6, %cst {dimension_numbers = #tpu.dot_dimension_numbers<[0], [0], [1], [1], [0, 1, 1, 1], [], []>} : vector<16x32xbf16>, vector<16x128xbf16>, vector<32x128xf32> -> vector<32x128xf32>
    %11 = vector.extract_strided_slice %10 {offsets = [0, 0], sizes = [16, 128], strides = [1, 1]} : vector<32x128xf32> to vector<16x128xf32>
    %12 = arith.mulf %11, %9 : vector<16x128xf32>
    %13 = vector.extract_strided_slice %10 {offsets = [16, 0], sizes = [16, 128], strides = [1, 1]} : vector<32x128xf32> to vector<16x128xf32>
    %cst_8 = arith.constant 0.000000e+00 : f32
    %14 = vector.broadcast %cst_8 : f32 to vector<16x128xf32>
    %15 = arith.subf %14, %13 : vector<16x128xf32>
    %16 = arith.mulf %15, %9 : vector<16x128xf32>
    %17 = tpu.concatenate %12, %16 in 1 : vector<16x128xf32>, vector<16x128xf32> -> vector<16x256xf32>
    %cst_9 = arith.constant 0.000000e+00 : f32
    %18 = vector.broadcast %cst_9 : f32 to vector<16x128xf32>
    %19 = arith.subf %18, %16 : vector<16x128xf32>
    %20 = tpu.concatenate %19, %12 in 1 : vector<16x128xf32>, vector<16x128xf32> -> vector<16x256xf32>
    %21 = tpu.concatenate %17, %20 in 0 : vector<16x256xf32>, vector<16x256xf32> -> vector<32x256xf32>
    %22 = arith.truncf %21 : vector<32x256xf32> to vector<32x256xbf16>
    %cst_10 = arith.constant dense<0.000000e+00> : vector<16x256xf32>
    %23 = tpu.matmul %4, %22, %cst_10 {dimension_numbers = #tpu.dot_dimension_numbers<[1], [0], [0], [1], [0, 0, 1, 1], [], []>} : vector<16x32xbf16>, vector<32x256xbf16>, vector<16x256xf32> -> vector<16x256xf32>
    %24 = arith.truncf %23 : vector<16x256xf32> to vector<16x256xbf16>
    %25 = vector.shape_cast %24 : vector<16x256xbf16> to vector<1x16x256xbf16>
    %c0_11 = arith.constant 0 : index
    %c0_12 = arith.constant 0 : index
    %c0_13 = arith.constant 0 : index
    %26 = vector.load %arg6[%c0_11, %c0_12, %c0_13] : memref<1x16x256xbf16, #tpu.memory_space<vmem>>, vector<1x16x256xbf16>
    tpu.vector_store %arg6[%c0_11, %c0_12, %c0_13], %25 {strides = array<i32>} : memref<1x16x256xbf16, #tpu.memory_space<vmem>>, vector<1x16x256xbf16>,
    return
  }
  func.func @transform_0(%arg0: i32, %arg1: i32) -> (i32, i32, i32) {
    %c0_i32 = arith.constant 0 : i32
    %c0_i32_0 = arith.constant 0 : i32
    %c0_i32_1 = arith.constant 0 : i32
    return %arg0, %c0_i32, %c0_i32_0 : i32, i32, i32
  }
  func.func @transform_1(%arg0: i32, %arg1: i32) -> (i32, i32, i32) {
    %c0_i32 = arith.constant 0 : i32
    %c0_i32_0 = arith.constant 0 : i32
    %c0_i32_1 = arith.constant 0 : i32
    return %arg0, %c0_i32, %c0_i32_0 : i32, i32, i32
  }
  func.func @transform_2(%arg0: i32, %arg1: i32) -> (i32, i32, i32) {
    %c0_i32 = arith.constant 0 : i32
    %c0_i32_0 = arith.constant 0 : i32
    return %arg0, %c0_i32, %arg1 : i32, i32, i32
  }
  func.func @transform_3(%arg0: i32, %arg1: i32) -> (i32, i32, i32) {
    %c0_i32 = arith.constant 0 : i32
    %c0_i32_0 = arith.constant 0 : i32
    return %arg0, %c0_i32, %arg1 : i32, i32, i32
  }
  func.func @transform_4(%arg0: i32, %arg1: i32) -> (i32, i32, i32) {
    %c0_i32 = arith.constant 0 : i32
    %c0_i32_0 = arith.constant 0 : i32
    return %arg0, %c0_i32, %arg1 : i32, i32, i32
  }
}

</mosaic_0001>

<bundles_post_ra>
// kernel: tpu_custom_call.1
= control target key start
LH: loop header
LB: loop body
LE: loop exit
PB: predicated region body
PF: predicated region fallthrough
CT: control target
= control target key end

     0   :  { %9 = vsyncpa [#allocation4], 0  ;;  %s1320_s0 = inlined_call_operand.vmem [shape: f32[2,3,32], index: 0, kind: input, shape index: {}]   ;;  %s1321_s1 = inlined_call_operand.vmem [shape: f32[2,16,3], index: 1, kind: input, shape index: {}]   ;;  %s1322_s2 = inlined_call_operand.vmem [shape: bf16[2,16,128], index: 2, kind: input, shape index: {}]   ;;  %s1323_s3 = inlined_call_operand.vmem [shape: bf16[2,16,128], index: 3, kind: input, shape index: {}]   ;;  %s1324_s4 = inlined_call_operand.hbm [shape: bf16[2,16,256], index: 4, kind: output, shape index: {}]  }
   0x1   :  { %11 = vsyncpa [#allocation4 + $0x1], 0  ;;  %s1114_s15 = smov 0   ;;  %s1116_s16 = smov 0  }
   0x2   :  { %s1118_s17 = smov 0   ;;  %s1120_s18 = smov 0  }
   0x3   :  { %s1122_s19 = smov 0   ;;  %s1124_s20 = smov 0  }
   0x4 LB: > { %s857_s21 = sadd.s32 4294967295, %s1074_s20   ;;  %s858_s22 = sadd.s32 4294967294, %s1074_s20   ;;  %s1074_s20 = sphi %s1124_s20, %s17_s20   ;;  %s1070_s19 = sphi %s1122_s19, %s1333_s19   ;;  %s1066_s18 = sphi %s1120_s18, %s1332_s18   ;;  %s1062_s17 = sphi %s1118_s17, %s1331_s17   ;;  %s1058_s16 = sphi %s1116_s16, %s1330_s16   ;;  %s1054_s15 = sphi %s1114_s15, %s1329_s15  }
   0x5   : > { %s29_s23 = sadd.s32 1, %s1070_s19  ;;  %s146_s24 = sadd.s32 1, %s1062_s17 }
   0x6   : > { %p31_p0 = scmp.ge.s32.totalorder %s29_s23, 2  ;;  %p156_p1 = scmp.ne.s32.totalorder %s1062_s17, %s1058_s16 }
   0x7   : > { %p157_p2 = scmp.eq.s32.totalorder %s857_s21, 1  ;;  %p162_p3 = scmp.ne.s32.totalorder %s1058_s16, %s1054_s15 }
   0x8   : > { %s1335_s23 = smov (%p31_p0, %s29_s23), 0  ;;  %p163_p5 = scmp.eq.s32.totalorder %s858_s22, 1 }
   0x9   : > { %p1154_p4 = por %p157_p2, %p156_p1  ;;  %s141_s26 = ssub.s32 %s1070_s19, %s1335_s23 }
   0xa   : > { %p861_p6 = scmp.ge.s32.totalorder %s1074_s20, 1  ;;  %p144_p7 = scmp.eq.s32.totalorder %s141_s26, 0 }
   0xb   : > { %p1161_p8 = por %p163_p5, %p162_p3  ;;  %p218_p9 = scmp.lt.s32.totalorder %s1074_s20, 3 }
   0xc   : > { %s1167_s28 = scalar_select %p144_p7, %s1062_s17, %s146_s24  }
   0xd   : > { %p219_p10 = pnand %p861_p6, %p218_p9 }
   0xe   : > { %p264_p11 = scmp.lt.s32.totalorder (!%p219_p10), %s1066_s18, 1  ;;  %v1076_v0 = vmov (!%p219_p10), 1   ;;  %v1077_v1 = vmov (!%p219_p10), 0   ;;  %v1078_v4 = vmov (!%p219_p10), 2   ;;  %v308_v5 = vlaneseq (!%p219_p10) }
   0xf   : > { %222 = sbr.rel (%p219_p10) target bundleno = 836 (0x344), region = 36  ;;  %984 = vset.pattern.permute.xlu1 (!%p219_p10), %v1076_v0  ;;  %983 = vset.pattern.permute.xlu0 (!%p219_p10), %v1077_v1  ;;  %v1079_v29 = vmov (!%p219_p10), 0.0   ;;  %v1080_v55 = vmov (!%p219_p10), 683565275   ;;  %v1081_v59 = vmov (!%p219_p10), 2475754826  }
  0x10   : > { %695 = vmatprep.mubr.bf16.mxu1 (!%p219_p10), %v1077_v1  ;;  %v309_v6 = vshrl.u32 (!%p219_p10), %v308_v5, 7  ;;  %v347_v17 = vand.u32 (!%p219_p10), 127, %v308_v5  ;;  %v1082_v61 = vmov (!%p219_p10), 2131351028   ;;  %v1083_v63 = vmov (!%p219_p10), 2102212464  }
  0x11   : > { %v1084_v1 = vmov (!%p219_p10), 920167782  }
  0x12   : > { %v324_v7 = vsub.s32 (!%p219_p10), 1, %v309_v6  ;;  %v310_v8 = vsub.s32 (!%p219_p10), 0, %v309_v6  ;;  %v340_v12 = vsub.s32 (!%p219_p10), 2, %v309_v6  ;;  %vm348_vm0 = vcmp.ge.s32.totalorder (!%p219_p10), %v347_v17, 16 }
  0x13   : > { %v349_v30 = vsel (!%p219_p10), %vm348_vm0, 1.5707964, %v1079_v29 }
  0x16   : > { %s1171_s29 = scalar_select %p264_p11, %s1066_s18, 1 }
  0x18   : > { %s889_s30 = sshll.u32 %s1171_s29, 4  ;;  %s863_s8 = sshll.u32 %s1171_s29, 2 }
  0x19   : > { %s272_s7 = scalar_lea.vmem %s1321_s1, %s889_s30  ;;  %s267_s11 = scalar_lea.vmem %s1320_s0, %s863_s8 }
  0x1a   : > { %v296_v2 = vld [vmem:[%s272_s7] sm:$0xff]  ;;  %v297_v3 = vld [vmem:[%s272_s7 + $0x8] sm:$0xff]  ;;  %s890_s12 = sshll.u32 %s1171_s29, 3  ;;  %s261_s29 = sand.u32 1, %s1058_s16  }
  0x1b   : > { %315 = vperm.xlu1 %984, %v296_v2   ;;  %300 = vperm.xlu0 %983, %v296_v2   ;;  %v295_v9 = vld [vmem:[%s267_s11] sm:$0x7]  ;;  %s280_s21 = scalar_lea.vmem %s1322_s2, %s890_s12  ;;  %s288_s26 = scalar_lea.vmem %s1323_s3, %s890_s12 }
  0x1c   : > { %v325_v13 = vrot.slane %v295_v9, %v324_v7  ;;  %v311_v14 = vrot.slane %v295_v9, %v310_v8  ;;  %v341_v18 = vrot.slane %v295_v9, %v340_v12  ;;  %v1085_v8 = vmov 1326507024   ;;  %s862_s30 = sshll.u32 %s261_s29, 4  ;;  %s894_s7 = sshll.u32 %s1066_s18, 8 }
  0x1d   : > { %s263_s5 = scalar_lea.vmem [#allocation3], %s862_s30  ;;  %s1272_s10 = scalar_lea.hbm %s1324_s4, %s894_s7 }
  0x1e   : > { %s736_s6 = sshll.u32 %s263_s5, 4  ;;  %s1274_s11 = scalar_lea.sflag [#allocation4], %s261_s29  ;;  %s1267_s6 = int_to_ptr.vmem [resolvable:$true] %s736_s6 }
  0x1f   : > { %319 = vperm.xlu1 %984, %v297_v3   ;;  %305 = vperm.xlu0 %983, %v297_v3   ;;  %s996_s12 = scalar_lea.vmem %s1267_s6, 256  ;;  %s1086_s18 = smov [#allocation3]  }
  0x20   : > { %p997_p12 = scmp.ne.s32.totalorder %s1267_s6, %s996_s12  ;;  %s1000_s13 = sshll.u32 %s1086_s18, 4  ;;  %s1001_s13 = int_to_ptr.vmem [resolvable:$false] %s1000_s13 }
  0x21   : > { %s1002_s14 = scalar_lea.vmem %s1001_s13, 512  ;;  %p1003_p1 = scmp.lt.s32.totalorder %s1267_s6, %s1001_s13 }
  0x22   : > { %p998_p13 = pnand %p997_p12, %p1154_p4  ;;  %p1004_p2 = scmp.lt.s32.totalorder %s1002_s14, %s996_s12 }
  0x23   : > { %986 = vset.pattern.permute.xlu1 %v1078_v4  ;;  %985 = vset.pattern.permute.xlu0 %v1078_v4 }
  0x24   : > { %335 = vperm.xlu1 %986, %v297_v3   ;;  %331 = vperm.xlu0 %985, %v296_v2   ;;  %p999_p0 = pneg %p998_p13  ;;  %p1005_p3 = por %p1004_p2, %p1003_p1 }
  0x26   : > { %p1006_p5 = pnand %p1005_p3, %p999_p0 }
  0x9a   : > { %v316_v10 = vpop.permute.xlu1 %315  ;;  %v301_v11 = vpop.permute.xlu0 %300 }
  0x9b   : > { %v326_v19 = vmul.f32 %v325_v13, %v316_v10  ;;  %v312_v20 = vmul.f32 %v311_v14, %v301_v11 }
  0x9d   : > { %v328_v25 = vadd.f32 %v326_v19, %v312_v20 }
  0x9e   : > { %v320_v15 = vpop.permute.xlu1 %319  ;;  %v306_v16 = vpop.permute.xlu0 %305 }
  0x9f   : > { %v327_v21 = vmul.f32 %v325_v13, %v320_v15  ;;  %v313_v22 = vmul.f32 %v311_v14, %v306_v16 }
  0xa1   : > { %v329_v26 = vadd.f32 %v327_v21, %v313_v22 }
  0xa3   : > { %v336_v23 = vpop.permute.xlu1 %335  ;;  %v332_v24 = vpop.permute.xlu0 %331 }
  0xa4   : > { %v343_v27 = vmul.f32 %v341_v18, %v336_v23  ;;  %v342_v28 = vmul.f32 %v341_v18, %v332_v24 }
  0xa6   : > { %v345_v31 = vadd.f32 %v343_v27, %v329_v26  ;;  %v344_v32 = vadd.f32 %v342_v28, %v328_v25 }
  0xa8   : > { %v1181_v33 = vsub.f32 %v345_v31, %v349_v30  ;;  %v1183_v34 = vsub.f32 %v344_v32, %v349_v30 }
  0xaa   : > { %v455_v35 = vand.u32 2147483647, %v1181_v33  ;;  %v458_v36 = vand.u32 2139095040, %v1181_v33  ;;  %v355_v37 = vand.u32 2139095040, %v1183_v34  ;;  %v352_v40 = vand.u32 2147483647, %v1183_v34 }
  0xab   : > { %vm457_vm15 = vcmp.lt.s32.totalorder %v1181_v33, 0 }
  0xac   : > { %v459_v38 = vshrl.u32 %v458_v36, 23  ;;  %v462_v39 = vand.u32 8388607, %v455_v35  ;;  %v356_v41 = vshrl.u32 %v355_v37, 23  ;;  %v1193_v46 = vand.u32 8388607, %v352_v40 }
  0xad   : > { %vm456_vm0 = vcmp.le.f32.partialorder %v455_v35, 0.7853982 }
  0xae   : > { %v874_v42 = vadd.s32 4294967169, %v459_v38  ;;  %v870_v43 = vadd.s32 4294967169, %v356_v41  ;;  %v463_v45 = vor.u32 8388608, %v462_v39  ;;  %v360_v53 = vor.u32 8388608, %v1193_v46 }
  0xb0   : > { %v465_v44 = vadd.s32 1, %v874_v42  ;;  %v362_v47 = vadd.s32 1, %v870_v43  ;;  %v1195_v52 = vshll.u32 %v463_v45, 8 }
  0xb2   : > { %vm466_vm1 = vcmp.gt.s32.totalorder %v465_v44, 0  ;;  %vm363_vm2 = vcmp.gt.s32.totalorder %v362_v47, 0 }
  0xb3   : > { %v467_v48 = vsel %vm466_vm1, %v465_v44, 0  ;;  %v364_v51 = vsel %vm363_vm2, %v362_v47, 0  ;;  %v400_v47 = vshll.u32 %v360_v53, 8  ;;  %vm354_vm1 = vcmp.lt.s32.totalorder %v1183_v34, 0 }
  0xb4   : > { %v468_v49 = vshrl.u32 %v467_v48, 5  ;;  %v469_v50 = vand.u32 31, %v467_v48  ;;  %v1198_v57 = vshrl.u32 %v364_v51, 5  ;;  %v366_v58 = vand.u32 31, %v364_v51 }
  0xb5   : > { %vm1240_vm2 = vcmp.le.f32.partialorder %v352_v40, 0.7853982 }
  0xb6   : > { %v470_v54 = vsub.s32 32, %v469_v50  ;;  %v472_v56 = vshll.u32 %v1080_v55, %v469_v50  ;;  %v475_v60 = vshll.u32 %v1081_v59, %v469_v50  ;;  %v478_v62 = vshll.u32 %v1082_v61, %v469_v50 }
  0xb7   : > { %v481_v0 = vshll.u32 %v1083_v63, %v469_v50  ;;  %v484_v2 = vshll.u32 %v1084_v1, %v469_v50  ;;  %vm487_vm3 = vcmp.lt.s32.totalorder %v468_v49, 1  ;;  %vm488_vm4 = vcmp.lt.s32.totalorder %v468_v49, 2 }
  0xb8   : > { %v473_v3 = vshrl.u32 %v1081_v59, %v470_v54  ;;  %v476_v4 = vshrl.u32 %v1082_v61, %v470_v54  ;;  %v479_v5 = vshrl.u32 %v1083_v63, %v470_v54  ;;  %v471_v6 = vshrl.u32 %v1080_v55, %v470_v54 }
  0xb9   : > { %v482_v7 = vshrl.u32 %v1084_v1, %v470_v54  ;;  %v485_v9 = vshrl.u32 %v1085_v8, %v470_v54  ;;  %v367_v13 = vsub.s32 32, %v366_v58  ;;  %vm489_vm5 = vcmp.lt.s32.totalorder %v468_v49, 3 }
  0xba   : > { %v474_v10 = vor.u32 %v473_v3, %v472_v56  ;;  %v477_v11 = vor.u32 %v476_v4, %v475_v60  ;;  %v480_v12 = vor.u32 %v479_v5, %v478_v62  ;;  %vm490_vm6 = vcmp.lt.s32.totalorder %v468_v49, 4 }
  0xbb   : > { %v483_v14 = vor.u32 %v482_v7, %v481_v0  ;;  %v486_v15 = vor.u32 %v485_v9, %v484_v2  ;;  %v369_v23 = vshll.u32 %v1080_v55, %v366_v58  ;;  %v370_v26 = vshrl.u32 %v1081_v59, %v367_v13 }
  0xbc   : > { %v491_v16 = vsel %vm487_vm3, %v471_v6, %v474_v10  ;;  %v492_v17 = vsel %vm490_vm6, %v480_v12, 2102212464  ;;  %v495_v18 = vsel %vm487_vm3, %v474_v10, %v477_v11  ;;  %v499_v19 = vsel %vm487_vm3, %v477_v11, %v480_v12 }
  0xbd   : > { %v493_v20 = vsel %vm489_vm5, %v477_v11, %v492_v17  ;;  %v496_v21 = vsel %vm490_vm6, %v483_v14, 920167782  ;;  %v500_v22 = vsel %vm490_vm6, %v486_v15, 1326507024  ;;  %v372_v27 = vshll.u32 %v1081_v59, %v366_v58 }
  0xbe   : > { %v497_v24 = vsel %vm489_vm5, %v480_v12, %v496_v21  ;;  %v501_v25 = vsel %vm489_vm5, %v483_v14, %v500_v22  ;;  %v494_v28 = vsel %vm488_vm4, %v491_v16, %v493_v20  ;;  %v373_v31 = vshrl.u32 %v1082_v61, %v367_v13 }
  0xbf   : > { %v498_v29 = vsel %vm488_vm4, %v495_v18, %v497_v24  ;;  %v502_v30 = vsel %vm488_vm4, %v499_v19, %v501_v25  ;;  %v371_v39 = vor.u32 %v370_v26, %v369_v23  ;;  %v375_v42 = vshll.u32 %v1082_v61, %v366_v58 }
  0xc0   : > { %v1207_v32 = vmul.u32.u64.low %v1195_v52, %v502_v30  ;;  %v1208_v36 = vmul.u32.u64.high %v1195_v52, %v502_v30, %v1207_v32  ;;  %v1211_v37 = vmul.u32.u64.low %v1195_v52, %v498_v29  ;;  %v1212_v38 = vmul.u32.u64.high %v1195_v52, %v498_v29, %v1211_v37 }
  0xc1   : > { %v374_v41 = vor.u32 %v373_v31, %v372_v27  ;;  %v376_v43 = vshrl.u32 %v1083_v63, %v367_v13  ;;  %v378_v44 = vshll.u32 %v1083_v63, %v366_v58  ;;  %v379_v45 = vshrl.u32 %v1084_v1, %v367_v13 }
  0xc2   : > { %v382_v46 = vshrl.u32 %v1085_v8, %v367_v13  ;;  %v510_v48 = vmul.u32 %v1195_v52, %v494_v28  ;;  %v368_v49 = vshrl.u32 %v1080_v55, %v367_v13  ;;  %v381_v51 = vshll.u32 %v1084_v1, %v366_v58 }
  0xc3   : > { %v377_v50 = vor.u32 %v376_v43, %v375_v42  ;;  %vm512_vm7 = vc.u32 %v1208_v36, %v1211_v37  ;;  %v513_v54 = vadd.s32 1, %v1212_v38  ;;  %v380_v56 = vor.u32 %v379_v45, %v378_v44 }
  0xc4   : > { %vm384_vm8 = vcmp.lt.s32.totalorder %v1198_v57, 1  ;;  %v383_v59 = vor.u32 %v382_v46, %v381_v51  ;;  %vm386_vm9 = vcmp.lt.s32.totalorder %v1198_v57, 3  ;;  %vm387_vm10 = vcmp.lt.s32.totalorder %v1198_v57, 4 }
  0xc5   : > { %v392_v60 = vsel %vm384_vm8, %v371_v39, %v374_v41  ;;  %v514_v53 = vsel %vm512_vm7, %v513_v54, %v1212_v38  ;;  %v389_v61 = vsel %vm387_vm10, %v377_v50, 2102212464  ;;  %v393_v52 = vsel %vm387_vm10, %v380_v56, 920167782 }
  0xc6   : > { %v396_v55 = vsel %vm384_vm8, %v374_v41, %v377_v50  ;;  %v515_v62 = vadd.s32 %v514_v53, %v510_v48  ;;  %vm385_vm11 = vcmp.lt.s32.totalorder %v1198_v57, 2  ;;  %v394_v58 = vsel %vm386_vm9, %v377_v50, %v393_v52 }
  0xc7   : > { %v397_v63 = vsel %vm387_vm10, %v383_v59, 1326507024  ;;  %v388_v0 = vsel %vm384_vm8, %v368_v49, %v371_v39  ;;  %v390_v1 = vsel %vm386_vm9, %v374_v41, %v389_v61  ;;  %v395_v2 = vsel %vm385_vm11, %v392_v60, %v394_v58 }
  0xc8   : > { %v398_v3 = vsel %vm386_vm9, %v380_v56, %v397_v63  ;;  %v516_v4 = vadd.s32 536870912, %v515_v62  ;;  %v1222_v6 = vmul.u32.u64.low %v400_v47, %v395_v2  ;;  %v1223_v7 = vmul.u32.u64.high %v400_v47, %v395_v2, %v1222_v6 }
  0xc9   : > { %v399_v5 = vsel %vm385_vm11, %v396_v55, %v398_v3  ;;  %v391_v11 = vsel %vm385_vm11, %v388_v0, %v390_v1  ;;  %v511_v27 = vadd.s32 %v1211_v37, %v1208_v36  ;;  %vm558_vm5 = vcmask 261120  }
  0xca   : > { %v1225_v8 = vmul.u32.u64.low %v400_v47, %v399_v5  ;;  %v1226_v9 = vmul.u32.u64.high %v400_v47, %v399_v5, %v1225_v8  ;;  %v517_v10 = vshrl.u32 %v516_v4, 30  ;;  %v410_v13 = vadd.s32 1, %v1223_v7 }
  0xcb   : > { %v407_v57 = vmul.u32 %v400_v47, %v391_v11  ;;  %v987_v11 = vld [vmem:[%s280_s21] sm:$0xff]   ;;  %vm547_vm7 = vweird.f32 %v1181_v33  ;;  %vm444_vm11 = vweird.f32 %v1183_v34 }
  0xcc   : > { %v518_v12 = vshll.u32 %v517_v10, 30  ;;  %vm409_vm12 = vc.u32 %v1226_v9, %v1222_v6  ;;  %v408_v48 = vadd.s32 %v1222_v6, %v1226_v9  ;;  %v541_v59 = vsub.s32 4, %v517_v10  ;;  %902 = vmatprep.subr.bf16.mxu0 %v987_v11 }
  0xcd   : > { %v411_v15 = vsel %vm409_vm12, %v410_v13, %v1223_v7  ;;  %903 = vmatpush3.bf16.msra.mxu0 %v987_v11  ;;  %vm592_vm12 = vcmask 130048  }
  0xce   : > { %v519_v14 = vsub.s32 %v515_v62, %v518_v12  ;;  %v412_v16 = vadd.s32 %v411_v15, %v407_v57  ;;  %v542_v62 = vsel %vm457_vm15, %v541_v59, %v517_v10 }
  0xcf   : > { %v544_v1 = vsel %vm456_vm0, 0, %v542_v62 }
  0xd0   : > { %v521_v17 = vsub.s32 0, %v519_v14  ;;  %v413_v18 = vadd.s32 536870912, %v412_v16  ;;  %v548_v3 = vand.u32 3, %v544_v1 }
  0xd2   : > { %v875_v19 = vmin.u32 %v521_v17, %v519_v14  ;;  %v414_v20 = vshrl.u32 %v413_v18, 30  ;;  %vm553_vm3 = vcmp.eq.s32.totalorder %v548_v3, 2  ;;  %vm550_vm4 = vcmp.eq.s32.totalorder %v548_v3, 0 }
  0xd3   : > { %vm549_vm6 = vcmp.lt.s32.totalorder %v548_v3, 2 }
  0xd4   : > { %v523_v21 = vclz %v875_v19  ;;  %v415_v22 = vshll.u32 %v414_v20, 30  ;;  %v438_v5 = vsub.s32 4, %v414_v20 }
  0xd6   : > { %v876_v23 = vadd.s32 4294967294, %v523_v21  ;;  %v416_v24 = vsub.s32 %v412_v16, %v415_v22  ;;  %v439_v10 = vsel %vm354_vm1, %v438_v5, %v414_v20 }
  0xd7   : > { %v441_v57 = vsel %vm1240_vm2, 0, %v439_v10 }
  0xd8   : > { %vm877_vm13 = vcmp.lt.s32.totalorder %v876_v23, 0  ;;  %v418_v26 = vsub.s32 0, %v416_v24  ;;  %v445_v16 = vand.u32 3, %v441_v57 }
  0xd9   : > { %v526_v25 = vsel %vm877_vm13, 0, %v876_v23 }
  0xda   : > { %v527_v28 = vsub.s32 32, %v526_v25  ;;  %v531_v29 = vsub.s32 4294967266, %v526_v25  ;;  %v871_v30 = vmin.u32 %v418_v26, %v416_v24  ;;  %v528_v31 = vshll.u32 %v519_v14, %v526_v25 }
  0xdb   : > { %vm450_vm8 = vcmp.eq.s32.totalorder %v445_v16, 2  ;;  %vm447_vm9 = vcmp.eq.s32.totalorder %v445_v16, 0  ;;  %vm446_vm10 = vcmp.lt.s32.totalorder %v445_v16, 2 }
  0xdc   : > { %v529_v32 = vshrl.u32 %v511_v27, %v527_v28  ;;  %v532_v38 = vadd.s32 127, %v531_v29  ;;  %v420_v39 = vclz %v871_v30  ;;  %v896_v29 = vld [vmem:[%s288_s26] sm:$0xff]  }
  0xde   : > { %v530_v41 = vor.u32 %v529_v32, %v528_v31  ;;  %v533_v42 = vshll.u32 %v532_v38, 23  ;;  %v872_v43 = vadd.s32 4294967294, %v420_v39  ;;  %v898_v31 = vunpack.c.h.bf16 %v896_v29 }
  0xe0   : > { %v534_v44 = vor.u32 4788187, %v533_v42  ;;  %vm873_vm14 = vcmp.lt.s32.totalorder %v872_v43, 0  ;;  %v537_v46 = vcvt.s32.f32 %v530_v41 }
  0xe1   : > { %v423_v47 = vsel %vm873_vm14, 0, %v872_v43 }
  0xe2   : > { %v535_v45 = vand.u32 2147483647, %v534_v44  ;;  %v424_v49 = vsub.s32 32, %v423_v47  ;;  %v428_v50 = vsub.s32 4294967266, %v423_v47  ;;  %v425_v37 = vshll.u32 %v416_v24, %v423_v47 }
  0xe4   : > { %v538_v36 = vmul.f32 %v537_v46, %v535_v45  ;;  %v426_v51 = vshrl.u32 %v408_v48, %v424_v49  ;;  %v429_v54 = vadd.s32 127, %v428_v50 }
  0xe6   : > { %v539_v56 = vxor.u32 2147483648, %v538_v36  ;;  %v427_v60 = vor.u32 %v426_v51, %v425_v37  ;;  %v430_v53 = vshll.u32 %v429_v54, 23 }
  0xe8   : > { %v540_v61 = vsel %vm457_vm15, %v539_v56, %v538_v36  ;;  %v431_v55 = vor.u32 4788187, %v430_v53  ;;  %v434_v63 = vcvt.s32.f32 %v427_v60 }
  0xe9   : > { %v543_v52 = vsel %vm456_vm0, %v1181_v33, %v540_v61 }
  0xea   : > { %988 = vcosq.f32 %v543_v52  ;;  %v432_v58 = vand.u32 2147483647, %v431_v55 }
  0xeb   : > { %990 = vsinq.f32 %v543_v52 }
  0xec   : > { %v435_v0 = vmul.f32 %v434_v63, %v432_v58 }
  0xee   : > { %v436_v2 = vxor.u32 2147483648, %v435_v0 }
  0xf0   : > { %v437_v4 = vsel %vm354_vm1, %v436_v2, %v435_v0 }
  0xf1   : > { %v440_v6 = vsel %vm1240_vm2, %v1183_v34, %v437_v4  ;;  %v897_v34 = vunpack.c.l.bf16 %v896_v29 }
  0xf2   : > { %992 = vcosq.f32 %v440_v6 }
  0xf3   : > { %994 = vsinq.f32 %v440_v6 }
  0xf4   : > { %v989_v7 = vpop.eup %988 }
  0xf5   : > { %v991_v8 = vpop.eup %990  ;;  %v554_v9 = vxor.u32 2147483648, %v989_v7 }
  0xf6   : > { %v551_v40 = vxor.u32 2147483648, %v991_v8 }
  0xf7   : > { %v555_v12 = vsel %vm553_vm3, %v554_v9, %v991_v8 }
  0xf8   : > { %v552_v13 = vsel %vm550_vm4, %v989_v7, %v551_v40 }
  0xf9   : > { %v556_v14 = vsel %vm549_vm6, %v552_v13, %v555_v12 }
  0xfa   : > { %v557_v15 = vsel %vm547_vm7, nan, %v556_v14 }
  0xfb   : > { %560 = vst.msk [vmem:[#allocation2 + $0x8] sm:$0xff] %vm558_vm5, %v557_v15 }
  0xfc   : > { %v993_v17 = vpop.eup %992 }
  0xfd   : > { %v995_v18 = vpop.eup %994  ;;  %v451_v19 = vxor.u32 2147483648, %v993_v17 }
  0xfe   : > { %v448_v20 = vxor.u32 2147483648, %v995_v18 }
  0xff   : > { %v452_v21 = vsel %vm450_vm8, %v451_v19, %v995_v18 }
 0x100   : > { %v449_v22 = vsel %vm447_vm9, %v993_v17, %v448_v20 }
 0x101   : > { %v453_v23 = vsel %vm446_vm10, %v449_v22, %v452_v21 }
 0x102   : > { %v454_v33 = vsel %vm444_vm11, nan, %v453_v23  ;;  %v562_v24 = vld [vmem:[#allocation2 + $0x8] sm:$0xff] }
 0x103   : > { %559 = vst.msk [vmem:[#allocation2] sm:$0xff] %vm558_vm5, %v454_v33 }
 0x10a   : > { %v561_v25 = vld [vmem:[#allocation2] sm:$0xff] }
 0x10b   : > { %v563_v26 = vpack.c.bf16 %v562_v24, %v561_v25 }
 0x10d   : > { %570 = vxpose.xlu1.c.b16.start.end [1/1] (short) (narrow) %v563_v26, 32 }
 0x173   : > { %v578_v27 = vpop.trf.xlu1 }
 0x174   : > { %904 = vmatprep.mubr.msk.bf16.mxu0 %vm592_vm12, %v578_v27 }
 0x177   : > { %v579_v28 = vpop.trf.xlu1 }
 0x178   : > { %905 = vmatmul.mubr.msk.bf16.vlgmr.msra.gmra.mrb[0].mxu0 %vm592_vm12, %v579_v28 }
 0x24b   : > { %v906_v30 = vpop.f32.mrb[0].mxu0 }
 0x24c   : > { %v650_v32 = vsub.f32 0.0, %v906_v30  ;;  %v633_v38 = vpop.f32.mrb[1].mxu0 }
 0x24d   : > { %v907_v39 = vpop.f32.mrb[2].mxu0  ;;  %v648_v44 = vmul.f32 %v897_v34, %v633_v38 }
 0x24e   : > { %v651_v41 = vsub.f32 0.0, %v907_v39  ;;  %v636_v42 = vpop.f32.mrb[3].mxu0  ;;  %v652_v43 = vmul.f32 %v897_v34, %v650_v32 }
 0x24f   : > { %v649_v45 = vmul.f32 %v898_v31, %v636_v42 }
 0x250   : > { %v653_v46 = vmul.f32 %v898_v31, %v651_v41  ;;  %v654_v48 = vsub.f32 0.0, %v652_v43 }
 0x251   : > { %v656_v47 = vpack.c.bf16 %v649_v45, %v648_v44 }
 0x252   : > { %v655_v49 = vsub.f32 0.0, %v653_v46  ;;  %v657_v50 = vpack.c.bf16 %v653_v46, %v652_v43 }
 0x254   : > { %663 = vmatprep.subr.bf16.mxu1 %v657_v50  ;;  %v658_v36 = vpack.c.bf16 %v655_v49, %v654_v48 }
 0x255   : > { %664 = vmatpush1.bf16.msra.mxu1 %v656_v47 }
 0x256   : > { %665 = vmatprep.subr.bf16.mxu1 %v656_v47 }
 0x259   : > { %666 = vmatpush1.bf16.msra.mxu1 %v658_v36 }
 0x25c   : > { %881 = vmatmul.mubr.msk.bf16.vlgmr.msra.gmra.mrb[0].mxu1 %vm558_vm5, %v563_v26 }
 0x32f   : > { %v697_v37 = vpop.f32.mrb[0].mxu1 }
 0x330   : > { %v699_v51 = vpop.f32.mrb[1].mxu1 }
 0x331   : > { %v892_v54 = vpack.c.bf16 %v699_v51, %v697_v37  ;;  %v701_v56 = vpop.f32.mrb[2].mxu1 }
 0x332   : > { %v703_v59 = vpop.f32.mrb[3].mxu1 }
 0x333   : > { %718 = vst [vmem:[%s263_s5] sm:$0xff] %v892_v54  ;;  %v893_v60 = vpack.c.bf16 %v703_v59, %v701_v56 }
 0x335   : > { %719 = vst [vmem:[%s263_s5 + $0x8] sm:$0xff] %v893_v60 }
 0x336   : > { %1009 = shalt.err (!%p1006_p5)
}
 0x337   : > { %s1010_s21 = scalar_lea.hbm %s1272_s10, 256  ;;  %s1014_s26 = scalar_lea.hbm %s1324_s4, 512 }
 0x338   : > { %p1011_p6 = scmp.ne.s32.totalorder %s1272_s10, %s1010_s21  ;;  %p1015_p10 = scmp.lt.u32.totalorder %s1272_s10, %s1324_s4 }
 0x339   : > { %p1016_p11 = scmp.lt.u32.totalorder %s1014_s26, %s1010_s21  ;;  %p1018_p13 = scmp.lt.u32.totalorder %s1010_s21, %s1272_s10 }
 0x33a   : > { %p1012_p7 = pnand %p1011_p6, %p1154_p4 }
 0x33b   : > { %p1017_p12 = por %p1016_p11, %p1015_p10 }
 0x33c   : > { %p1013_p9 = pneg %p1012_p7 }
 0x33d   : > { %p1019_p0 = por %p1018_p13, %p1017_p12 }
 0x33f   : > { %p1020_p1 = pnand %p1019_p0, %p1013_p9 }
 0x341   : > { %1023 = shalt.err (!%p1020_p1)
}
 0x342   : > { %s1087_s5 = smov 128   ;;  %s1088_s7 = smov 8  }
 0x343   : > { %916 = dma.vmem_to_hbm [thread:$0]  (%p1154_p4), %s1267_s6, 256, %s1272_s10, %s1274_s11, %s1087_s5, %s1087_s5, %s1088_s7  }
 0x344 PF: > { %p922_p2 = scmp.ge.s32.totalorder %s1074_s20, 2  ;;  %s751_s8 = sand.u32 1, %s1054_s15  }
 0x345   : > { %s752_s9 = scalar_lea.sflag [#allocation4], %s751_s8 }
 0x346   : > { %p919_p3 = pnand %p922_p2, %p1161_p8 }
 0x348   : > { %1049 = dma.done.wait (!%p919_p3), %s752_s9, 256  }
 0x349   : > { %1051 = vsyncadd (!%p919_p3), %s752_s9, 4294967040  ;;  %s17_s20 = sadd.s32 1, %s1074_s20   ;;  %s1329_s15 = smov %s1058_s16 }
 0x34a   : > { %p14_p5 = scmp.ge.s32.totalorder %s17_s20, 4   ;;  %s1330_s16 = smov %s1062_s17 }
 0x34b   : > { %s1331_s17 = smov %s1167_s28  ;;  %s1332_s18 = smov %s1070_s19 }
 0x34c   : > { %s1333_s19 = smov %s1335_s23  ;;  %16 = sbr.rel (!%p14_p5) target bundleno = 4 (0x4), region = 84 }
 0x353   :  { %757 = vsyncpa [#allocation4], 1 }
 0x354   :  { %759 = vsyncpa [#allocation4 + $0x1], 1 }

</bundles_post_ra>
